<compile_context>
chip_gen: v6e
topology: v6e:2x2x1
jax: 0.10.0
libtpu: 0.0.40
codegen_flags: <defaults>
</compile_context>

<pallas_src>
import functools
import math

import jax
import jax.numpy as jnp
import numpy as np
from jax.experimental import pallas as pl
from jax.experimental.pallas import tpu as pltpu


_SMALL_DATA_BYTES = 2 * 1024 * 1024   # whole array as a single VMEM block
_BLOCK_BYTES = 2 * 1024 * 1024        # per-step block target for the tiled path


def _apply_scale(x, c):
    # Matches `weight * c` (python float c) for floating dtypes exactly;
    # falls back to f32 math for non-float params (robustness only).
    if jnp.issubdtype(x.dtype, jnp.floating):
        return x * jnp.asarray(c, dtype=x.dtype)
    return (x.astype(jnp.float32) * c).astype(x.dtype)


def _scale_kernel(w_ref, o_ref, *, c):
    # One vld + one vmul + one vst per vreg -> far below any VLIW slot budget;
    # the op is purely HBM-bound.  c is a trace-time Python float.
    o_ref[...] = _apply_scale(w_ref[...], c)


def _round_up(x, m):
    return ((x + m - 1) // m) * m


def _sublane(dtype):
    # packed sublane tile: 8 rows for 4-byte, 16 for 2-byte, 32 for 1-byte
    return max(8, 32 // jnp.dtype(dtype).itemsize)


def _cost(n, itemsize):
    return pl.CostEstimate(flops=n, transcendentals=0,
                           bytes_accessed=2 * n * itemsize)


def _scale_2d(x2, c):
    """Run the scale kernel over a 2-D array (rows, cols); returns same shape."""
    rows, cols = x2.shape
    dtype = x2.dtype
    itemsize = jnp.dtype(dtype).itemsize
    sub = _sublane(dtype)
    n = rows * cols
    kernel = functools.partial(_scale_kernel, c=c)

    # Padded-layout VMEM footprint of the whole array as a single block.
    whole_bytes = _round_up(rows, sub) * _round_up(cols, 128) * itemsize
    if whole_bytes <= _SMALL_DATA_BYTES:
        # No-grid fast path: one whole-array block, no per-grid-step overhead.
        return pl.pallas_call(
            kernel,
            out_shape=jax.ShapeDtypeStruct((rows, cols), dtype),
            in_specs=[pl.BlockSpec(memory_space=pltpu.MemorySpace.VMEM)],
            out_specs=pl.BlockSpec(memory_space=pltpu.MemorySpace.VMEM),
            cost_estimate=_cost(n, itemsize),
        )(x2)

    # Tiled path: ~2 MiB row blocks, lane dim kept at full extent.
    th = max(sub, (_BLOCK_BYTES // (cols * itemsize)) // sub * sub)
    th = min(th, _round_up(rows, sub))
    grid = (pl.cdiv(rows, th),)          # ragged final row-block is masked
    return pl.pallas_call(
        kernel,
        out_shape=jax.ShapeDtypeStruct((rows, cols), dtype),
        grid=grid,
        in_specs=[pl.BlockSpec((th, cols), lambda i: (i, 0))],
        out_specs=pl.BlockSpec((th, cols), lambda i: (i, 0)),
        compiler_params=pltpu.CompilerParams(
            dimension_semantics=("parallel",)),   # v7x megacore sharding
        cost_estimate=_cost(n, itemsize),
    )(x2)


def equalized_weight(weight):
    """Pallas implementation of EqualizedWeight.forward().

    weight: any-shaped parameter tensor (>=1-D).
    returns weight * (1 / sqrt(prod(shape[1:]))), same shape and dtype.
    """
    shape = weight.shape
    dtype = weight.dtype
    itemsize = jnp.dtype(dtype).itemsize
    sub = _sublane(dtype)
    c = float(1.0 / math.sqrt(float(np.prod(shape[1:], dtype=np.float64))))
    n = int(np.prod(shape))

    # Fast path: 2-D weight that is already lane-dense -> no reshape at all.
    if (weight.ndim == 2 and shape[1] % 128 == 0
            and sub * shape[1] * itemsize <= _BLOCK_BYTES):
        return _scale_2d(weight, c)

    flat = weight.reshape(-1)            # contiguous reshape; no pad, no slice

    if n % 128 == 0:
        # Lane-dense 2-D view: widest multiple-of-128 column count that divides
        # n exactly, so no padding is ever materialised.
        cols = 128
        for cand in (2048, 1024, 512, 256):
            if n % cand == 0:
                cols = cand
                break
        out2 = _scale_2d(flat.reshape(n // cols, cols), c)
        return out2.reshape(shape)

    if n * 32 <= _SMALL_DATA_BYTES:
        # Small, unaligned total size (e.g. conv weights with odd kernels):
        # a single (1, n) full-extent block -- no padding, no masking.
        out2 = _scale_2d(flat.reshape(1, n), c)
        return out2.reshape(shape)

    # Rare: large AND not a multiple of 128.  Kernel on the aligned prefix,
    # plain JAX on the (<512-element) tail -- no whole-array pad round-trip.
    tw = 512
    n_main = (n // tw) * tw
    main = _scale_2d(flat[:n_main].reshape(n_main // tw, tw), c)
    tail = _apply_scale(flat[n_main:], c)
    return jnp.concatenate([main.reshape(-1), tail]).reshape(shape)


def equalized_weight_reference(weight):
    """Pure-JAX reference (matches the PyTorch forward)."""
    c = 1.0 / math.sqrt(float(np.prod(weight.shape[1:], dtype=np.float64)))
    return weight * c


if __name__ == "__main__":
    key = jax.random.PRNGKey(0)
    keys = jax.random.split(key, 7)

    # Shapes typical of EqualizedWeight usage (StyleGAN-style equalized lr),
    # plus cases that exercise every code path: no-grid small block, native
    # aligned 2-D fast path, tiled grid with ragged final block, bf16 packing,
    # unaligned small, and the large-unaligned prefix+tail fallback.
    cases = {
        "conv":            jax.random.normal(keys[0], (32, 32, 3, 3), jnp.float32),
        "linear":          jax.random.normal(keys[1], (32, 32), jnp.float32),
        "ragged":          jax.random.normal(keys[2], (4, 16, 5), jnp.float32),
        "aligned2d":       jax.random.normal(keys[3], (16, 256), jnp.float32),
        "tiled":           jax.random.normal(keys[4], (512, 1536), jnp.float32),
        "bf16":            jax.random.normal(keys[5], (24, 128), jnp.bfloat16),
        "large_unaligned": jax.random.normal(keys[6], (5, 105, 1001), jnp.float32),
    }

    fn = jax.jit(equalized_weight)
    for name, w in cases.items():
        out = jax.block_until_ready(fn(w))
        ref = equalized_weight_reference(w)
        assert out.shape == w.shape and out.dtype == w.dtype, name
        if w.dtype == jnp.bfloat16:
            ok = jnp.allclose(out.astype(jnp.float32), ref.astype(jnp.float32),
                              atol=1e-2, rtol=1e-2)
        else:
            ok = jnp.allclose(out, ref, atol=1e-6, rtol=1e-6)
        assert ok, name

    print("KERNEL_OK")
</pallas_src>

<mosaic_0001>
module attributes {stable_mosaic.version = 11 : i64} {
  func.func @_scale_kernel(%arg0: memref<9x1024xf32, #tpu.memory_space<vmem>>, %arg1: memref<9x1024xf32, #tpu.memory_space<vmem>>) attributes {dimension_semantics = [], scalar_prefetch = 0 : i64, scratch_operands = 0 : i64, tpu.core_type = #tpu.core_type<tc>} {
    %c0 = arith.constant 0 : index
    %c0_0 = arith.constant 0 : index
    %0 = vector.load %arg0[%c0, %c0_0] : memref<9x1024xf32, #tpu.memory_space<vmem>>, vector<9x1024xf32>
    %cst = arith.constant 0.0589255653 : f32
    %1 = vector.broadcast %cst : f32 to vector<9x1024xf32>
    %2 = arith.mulf %0, %1 : vector<9x1024xf32>
    %c0_1 = arith.constant 0 : index
    %c0_2 = arith.constant 0 : index
    %3 = vector.load %arg1[%c0_1, %c0_2] : memref<9x1024xf32, #tpu.memory_space<vmem>>, vector<9x1024xf32>
    tpu.vector_store %arg1[%c0_1, %c0_2], %2 {strides = array<i32>} : memref<9x1024xf32, #tpu.memory_space<vmem>>, vector<9x1024xf32>,
    return
  }
}

</mosaic_0001>

<bundles_post_ra>
// kernel: equalized_weight.1
= control target key start
LH: loop header
LB: loop body
LE: loop exit
PB: predicated region body
PF: predicated region fallthrough
CT: control target
= control target key end

     0   :  { %s166_s0 = inlined_call_operand.vmem [shape: f32[9,1024], index: 0, kind: input, shape index: {}]   ;;  %s167_s1 = inlined_call_operand.vmem [shape: f32[9,1024], index: 1, kind: output, shape index: {}]  }
   0x1   :  { %v8_v0 = vld [vmem:[%s166_s0] sm:$0xff]  ;;  %v9_v1 = vld [vmem:[%s166_s0 + $0x8] sm:$0xff]  ;;  %v10_v2 = vld [vmem:[%s166_s0 + $0x10] sm:$0xff] }
   0x2   :  { %v24_v3 = vmul.f32 0.058925565, %v8_v0  ;;  %v25_v4 = vmul.f32 0.058925565, %v9_v1  ;;  %v26_v5 = vmul.f32 0.058925565, %v10_v2 }
   0x3   :  { %v11_v6 = vld [vmem:[%s166_s0 + $0x18] sm:$0xff]  ;;  %v12_v7 = vld [vmem:[%s166_s0 + $0x20] sm:$0xff]  ;;  %v13_v8 = vld [vmem:[%s166_s0 + $0x28] sm:$0xff] }
   0x4   :  { %40 = vst [vmem:[%s167_s1] sm:$0xff] %v24_v3  ;;  %41 = vst [vmem:[%s167_s1 + $0x8] sm:$0xff] %v25_v4  ;;  %v27_v9 = vmul.f32 0.058925565, %v11_v6  ;;  %v28_v10 = vmul.f32 0.058925565, %v12_v7  ;;  %v14_v12 = vld [vmem:[%s166_s0 + $0x30] sm:$0xff] }
   0x5   :  { %42 = vst [vmem:[%s167_s1 + $0x10] sm:$0xff] %v26_v5  ;;  %v29_v11 = vmul.f32 0.058925565, %v13_v8  ;;  %v15_v13 = vld [vmem:[%s166_s0 + $0x38] sm:$0xff]  ;;  %v16_v14 = vld [vmem:[%s166_s0 + $0x40] sm:$0x1] }
   0x6   :  { %43 = vst [vmem:[%s167_s1 + $0x18] sm:$0xff] %v27_v9  ;;  %44 = vst [vmem:[%s167_s1 + $0x20] sm:$0xff] %v28_v10  ;;  %v30_v15 = vmul.f32 0.058925565, %v14_v12  ;;  %v31_v16 = vmul.f32 0.058925565, %v15_v13 }
   0x7   :  { %45 = vst [vmem:[%s167_s1 + $0x28] sm:$0xff] %v29_v11  ;;  %v32_v17 = vmul.f32 0.058925565, %v16_v14  ;;  %v17_v18 = vld [vmem:[%s166_s0 + $0x48] sm:$0x1] }
   0x8   :  { %v18_v19 = vld [vmem:[%s166_s0 + $0x50] sm:$0x1]  ;;  %v19_v20 = vld [vmem:[%s166_s0 + $0x58] sm:$0x1]  ;;  %46 = vst [vmem:[%s167_s1 + $0x30] sm:$0xff] %v30_v15  ;;  %47 = vst [vmem:[%s167_s1 + $0x38] sm:$0xff] %v31_v16 }
   0x9   :  { %48 = vst [vmem:[%s167_s1 + $0x40] sm:$0x1] %v32_v17  ;;  %v33_v21 = vmul.f32 0.058925565, %v17_v18  ;;  %v34_v22 = vmul.f32 0.058925565, %v18_v19 }
   0xa   :  { %v35_v23 = vmul.f32 0.058925565, %v19_v20  ;;  %v20_v24 = vld [vmem:[%s166_s0 + $0x60] sm:$0x1]  ;;  %v21_v25 = vld [vmem:[%s166_s0 + $0x68] sm:$0x1] }
   0xb   :  { %v22_v26 = vld [vmem:[%s166_s0 + $0x70] sm:$0x1]  ;;  %49 = vst [vmem:[%s167_s1 + $0x48] sm:$0x1] %v33_v21  ;;  %50 = vst [vmem:[%s167_s1 + $0x50] sm:$0x1] %v34_v22 }
   0xc   :  { %51 = vst [vmem:[%s167_s1 + $0x58] sm:$0x1] %v35_v23  ;;  %v36_v27 = vmul.f32 0.058925565, %v20_v24  ;;  %v37_v28 = vmul.f32 0.058925565, %v21_v25 }
   0xd   :  { %v38_v29 = vmul.f32 0.058925565, %v22_v26  ;;  %v23_v30 = vld [vmem:[%s166_s0 + $0x78] sm:$0x1] }
   0xe   :  { %52 = vst [vmem:[%s167_s1 + $0x60] sm:$0x1] %v36_v27  ;;  %53 = vst [vmem:[%s167_s1 + $0x68] sm:$0x1] %v37_v28  ;;  %v39_v31 = vmul.f32 0.058925565, %v23_v30 }
   0xf   :  { %54 = vst [vmem:[%s167_s1 + $0x70] sm:$0x1] %v38_v29 }
  0x10   :  { %55 = vst [vmem:[%s167_s1 + $0x78] sm:$0x1] %v39_v31 }

</bundles_post_ra>
